<compile_context>
chip_gen: v5e
topology: v5e:2x2
jax: 0.10.0
libtpu: 0.0.40
codegen_flags: <defaults>
</compile_context>

<pallas_src>
import jax
import jax.numpy as jnp
from jax.experimental import pallas as pl
from jax.experimental.pallas import tpu as pltpu


def _bts_kernel(iT_ref, x_ref, o_ref):
    # iT_ref: SMEM (1,) f32 — precomputed inverse temperature.
    # Cast the scalar (not the tile) so bf16/fp16 tiles stay in their native dtype.
    scale = iT_ref[0].astype(x_ref.dtype)
    o_ref[...] = (x_ref[...] * scale).astype(o_ref.dtype)


def _vmem_budget():
    """(target_block_bytes, vmem_limit_bytes), gated on the chip generation."""
    try:
        phys = int(pltpu.get_tpu_info().vmem_capacity_bytes)
    except Exception:
        phys = 128 << 20  # v5e/v6e-style default if the query is unavailable
    if phys <= (64 << 20):         # v7x: 64 MiB physical per TensorCore
        return 4 << 20, 24 << 20   # 4 MiB blocks, ~16 MiB pipeline, 24 MiB scoped
    return 4 << 20, 32 << 20       # v5e / v6e: 128 MiB physical, raise scoped limit


def _slab_geometry(total, itemsize, target_block_bytes):
    """Lane-dense slab geometry for a flattened elementwise op.

    Returns (rows, lane, tm): the (padded) input is viewed as (rows, lane) and
    tiled with blocks of shape (tm, lane).
    """
    if total <= 128:
        return 1, total, 1                        # tiny input: one full block
    lane = 512 if total >= 8 * 512 else 128       # lane-dense multiple of 128
    rows = pl.cdiv(total, lane)
    max_rows = max(8, (target_block_bytes // (lane * itemsize)) // 8 * 8)
    tm = rows if rows <= max_rows else max_rows
    # v7x has 2 TensorCores: make sure the "parallel" grid axis has >= 2 blocks
    # whenever there is enough data to split (sublane-aligned halves).
    if pl.cdiv(rows, tm) < 2 and rows >= 16:
        tm = ((rows + 1) // 2 + 7) // 8 * 8
    return rows, lane, tm


def bayesian_temp_scaling_forward(x, iT_mean, iT_log_var, eps, transform="exp"):
    """Forward pass of BayesianTempScaling_N.

    x: logits of any shape.  iT_mean / iT_log_var / eps: scalars (the
    reparameterized posterior draw: log_iT = mean + eps * sqrt(exp(log_var))).
    """
    # Hoisted scalar work (done once, not per grid step):
    #   iT = T(mean + eps * sqrt(exp(log_var))) = T(mean + eps * exp(0.5*log_var))
    log_iT = (jnp.asarray(iT_mean, jnp.float32)
              + jnp.asarray(eps, jnp.float32)
              * jnp.exp(0.5 * jnp.asarray(iT_log_var, jnp.float32)))
    if transform == "exp":
        iT = jnp.exp(log_iT)
    elif transform == "softplus":
        iT = jax.nn.softplus(log_iT)
    elif callable(transform):
        iT = transform(log_iT)
    else:
        raise ValueError("transform argument {} not recognized".format(transform))
    iT = iT.reshape((1,)).astype(jnp.float32)

    orig_shape = x.shape
    x_flat = x.reshape(-1)
    total = x_flat.shape[0]

    target_block_bytes, vmem_limit = _vmem_budget()
    rows, lane, tm = _slab_geometry(total, jnp.dtype(x.dtype).itemsize,
                                    target_block_bytes)

    pad = rows * lane - total
    if pad:
        x_flat = jnp.pad(x_flat, (0, pad))
    x2d = x_flat.reshape(rows, lane)

    out2d = pl.pallas_call(
        _bts_kernel,
        out_shape=jax.ShapeDtypeStruct((rows, lane), x.dtype),
        grid_spec=pl.GridSpec(
            grid=(pl.cdiv(rows, tm),),
            in_specs=[
                pl.BlockSpec(memory_space=pltpu.SMEM),        # iT scalar, untiled
                pl.BlockSpec((tm, lane), lambda i: (i, 0)),   # x slab tile
            ],
            out_specs=pl.BlockSpec((tm, lane), lambda i: (i, 0)),
        ),
        compiler_params=pltpu.CompilerParams(
            dimension_semantics=("parallel",),
            vmem_limit_bytes=vmem_limit,
        ),
    )(iT, x2d)

    out = out2d.reshape(-1)
    if pad:
        out = out[:total]
    return out.reshape(orig_shape)


if __name__ == "__main__":
    key = jax.random.PRNGKey(0)
    k_x, k_eps = jax.random.split(key)

    # Small logits batch: 32 samples x 10 classes. The non-128-aligned class dim
    # exercises the lane-dense flatten + pad + slice-back path.
    x = jax.random.normal(k_x, (32, 10), dtype=jnp.float32)

    # Deterministic parameter values (nn.Parameter defaults in __init__).
    iT_mean = jnp.float32(1.0)
    iT_log_var = jnp.float32(0.0)

    # eps ~ N(0,1): the reparameterization noise of the forward pass.
    eps = jax.random.normal(k_eps, (), dtype=jnp.float32)

    out = bayesian_temp_scaling_forward(x, iT_mean, iT_log_var, eps)
    out = jax.block_until_ready(out)

    # Reference check in plain JAX (original formulation with sqrt(exp(.))).
    iT_ref = jnp.exp(iT_mean + eps * jnp.sqrt(jnp.exp(iT_log_var)))
    ref = x * iT_ref
    assert out.shape == x.shape
    assert jnp.allclose(out, ref, rtol=1e-6, atol=1e-6), "mismatch vs reference"

    print("KERNEL_OK")
</pallas_src>

<mosaic_0001>
module attributes {stable_mosaic.version = 11 : i64} {
  func.func @_bts_kernel(%arg0: i32, %arg1: memref<1xf32, #tpu.memory_space<smem>>, %arg2: memref<3x128xf32, #tpu.memory_space<vmem>>, %arg3: memref<3x128xf32, #tpu.memory_space<vmem>>) attributes {dimension_semantics = [#tpu.dimension_semantics<parallel>], iteration_bounds = array<i64: 1>, scalar_prefetch = 0 : i64, scratch_operands = 0 : i64, tpu.core_type = #tpu.core_type<tc>, window_params = [{transform_indices = @transform_0, window_bounds = array<i64: 1>}, {transform_indices = @transform_1, window_bounds = array<i64: 3, 128>}, {transform_indices = @transform_2, window_bounds = array<i64: 3, 128>}]} {
    %c0 = arith.constant 0 : index
    %0 = memref.load %arg1[%c0] : memref<1xf32, #tpu.memory_space<smem>>
    %c0_0 = arith.constant 0 : index
    %c0_1 = arith.constant 0 : index
    %1 = vector.load %arg2[%c0_0, %c0_1] : memref<3x128xf32, #tpu.memory_space<vmem>>, vector<3x128xf32>
    %2 = vector.broadcast %0 : f32 to vector<3x128xf32>
    %3 = arith.mulf %1, %2 : vector<3x128xf32>
    %c0_2 = arith.constant 0 : index
    %c0_3 = arith.constant 0 : index
    %4 = vector.load %arg3[%c0_2, %c0_3] : memref<3x128xf32, #tpu.memory_space<vmem>>, vector<3x128xf32>
    tpu.vector_store %arg3[%c0_2, %c0_3], %3 {strides = array<i32>} : memref<3x128xf32, #tpu.memory_space<vmem>>, vector<3x128xf32>,
    return
  }
  func.func @transform_0(%arg0: i32) -> i32 {
    %c0_i32 = arith.constant 0 : i32
    %c0_i32_0 = arith.constant 0 : i32
    return %c0_i32 : i32
  }
  func.func @transform_1(%arg0: i32) -> (i32, i32) {
    %c0_i32 = arith.constant 0 : i32
    %c0_i32_0 = arith.constant 0 : i32
    return %arg0, %c0_i32 : i32, i32
  }
  func.func @transform_2(%arg0: i32) -> (i32, i32) {
    %c0_i32 = arith.constant 0 : i32
    %c0_i32_0 = arith.constant 0 : i32
    return %arg0, %c0_i32 : i32, i32
  }
}

</mosaic_0001>

<bundles_post_ra>
// kernel: tpu_custom_call.1
= control target key start
LH: loop header
LB: loop body
LE: loop exit
PB: predicated region body
PF: predicated region fallthrough
CT: control target
= control target key end

     0   :  { %8 = vsyncpa [#allocation4], 0  ;;  %s129_s0 = inlined_call_operand.<no memory space> [shape: f32[1], index: 0, kind: input, shape index: {}]   ;;  %s130_s1 = inlined_call_operand.hbm [shape: f32[3,128], index: 1, kind: input, shape index: {}]   ;;  %s131_s2 = inlined_call_operand.hbm [shape: f32[3,128], index: 2, kind: output, shape index: {}]  }
   0x1   :  { %9 = vsyncpa [#allocation5], 0  ;;  %s17_s11 = sshll.u32 %s130_s1, 4  ;;  %s103_s12 = smov [#allocation3]   ;;  %s18_s11 = int_to_ptr.hbm [resolvable:$true] %s17_s11 }
   0x2   :  { %s19_s13 = sshll.u32 %s103_s12, 4  ;;  %s20_s13 = int_to_ptr.vmem [resolvable:$true] %s19_s13 }
   0x3   :  { %22 = dma.hbm_to_vmem [thread:$0]  %s18_s11, 64, %s20_s13, [#allocation4]  }
   0x4   :  { %99 = dma.done.wait [#allocation4], 64  }
   0x5   :  { %100 = vsyncadd [#allocation4], 4294967232  ;;  %v29_v0 = vstv %s129_s0  ;;  %s104_s16 = smov [#allocation6]   ;;  %s39_s20 = sshll.u32 %s131_s2, 4  ;;  %v28_v1 = vld [vmem:[#allocation3] sm:$0x7]  ;;  %s40_s20 = int_to_ptr.hbm [resolvable:$true] %s39_s20 }
   0x6   :  { %s37_s17 = sshll.u32 %s104_s16, 4  ;;  %v30_v2 = vmul.f32 %v29_v0, %v28_v1  ;;  %s38_s17 = int_to_ptr.vmem [resolvable:$true] %s37_s17 }
   0x8   :  { %31 = vst [vmem:[#allocation6] sm:$0x7] %v30_v2 }
   0x9   :  { %42 = dma.vmem_to_hbm [thread:$0]  %s38_s17, 64, %s40_s20, [#allocation5]  }
   0xa   :  { %101 = dma.done.wait [#allocation5], 64  }
   0xb   :  { %102 = vsyncadd [#allocation5], 4294967232 }
   0xc   :  { %47 = vsyncpa [#allocation4], 1 }
   0xd   :  { %48 = vsyncpa [#allocation5], 1 }

</bundles_post_ra>
